<compile_context>
chip_gen: v7x
topology: tpu7x:2x2x1
jax: 0.10.0
libtpu: 0.0.40
codegen_flags: <defaults>
</compile_context>

<pallas_src>
import jax
import jax.numpy as jnp
from jax.experimental import pallas as pl
from jax.experimental.pallas import tpu as pltpu


def _round_up(n, m):
    return ((n + m - 1) // m) * m


def mlp_kernel(x_ref, w1_ref, b1_ref, w2_ref, b2_ref, w3_ref, b3_ref, o_ref):
    # Feature-major: x_ref (9, TILE_B) bf16, weights (out, in) bf16, biases (out, 1) f32.
    x = x_ref[...]

    # fc1 + ReLU: (16, 9) @ (9, B) -> (16, B)
    h1 = jnp.dot(w1_ref[...], x, preferred_element_type=jnp.float32) + b1_ref[...]
    h1 = jnp.maximum(h1, 0.0)

    # fc2 + ReLU: (8, 16) @ (16, B) -> (8, B)
    h2 = jnp.dot(w2_ref[...], h1.astype(w2_ref.dtype),
                 preferred_element_type=jnp.float32) + b2_ref[...]
    h2 = jnp.maximum(h2, 0.0)

    # fc3 + Sigmoid: (1, 8) @ (8, B) -> (1, B)  -- lane-dense output slab
    h3 = jnp.dot(w3_ref[...], h2.astype(w3_ref.dtype),
                 preferred_element_type=jnp.float32) + b3_ref[...]
    # sigmoid = 1 / (1 + exp(-h3)); exp and approx-reciprocal both issue on the EUP slot
    o_ref[...] = pl.reciprocal(1.0 + jnp.exp(-h3), approx=True).astype(o_ref.dtype)


def net_forward(x, params, *, tile_b=4096):
    """Forward pass of the 9->16->8->1 MLP.

    x: (batch, 9) float array.  params: as produced by init_params
    (weights stored (in, out), biases (1, out)).  Returns (batch, 1) float32.
    """
    w1, b1, w2, b2, w3, b3 = params
    batch = x.shape[0]

    # Lane-aligned batch tile; pad the batch so the grid divides evenly.
    tile = min(tile_b, _round_up(batch, 128))
    padded = _round_up(batch, tile)

    bf16 = jnp.bfloat16
    # Feature-major, bf16 x (the only operand that scales with batch).
    x_t = jnp.transpose(x).astype(bf16)                   # (9, batch)
    x_t = jnp.pad(x_t, ((0, 0), (0, padded - batch)))     # (9, padded)

    # Weights -> (out, in) bf16; biases -> (out, 1) f32 (broadcast along lanes).
    w1_t, w2_t, w3_t = (jnp.transpose(w).astype(bf16) for w in (w1, w2, w3))
    b1_t, b2_t, b3_t = (jnp.transpose(b).astype(jnp.float32) for b in (b1, b2, b3))

    grid = (padded // tile,)

    def resident(a):
        # Constant index_map -> block never changes -> stays VMEM-resident
        # (no re-DMA per grid step).
        return pl.BlockSpec(a.shape, lambda i: (0, 0))

    out_t = pl.pallas_call(
        mlp_kernel,
        out_shape=jax.ShapeDtypeStruct((1, padded), jnp.float32),
        grid=grid,
        in_specs=[
            pl.BlockSpec((9, tile), lambda i: (0, i)),    # x tile, pipelined over batch
            resident(w1_t), resident(b1_t),
            resident(w2_t), resident(b2_t),
            resident(w3_t), resident(b3_t),
        ],
        out_specs=pl.BlockSpec((1, tile), lambda i: (0, i)),   # lane-dense output
        compiler_params=pltpu.CompilerParams(
            dimension_semantics=("parallel",),            # shard batch across TCs on v7x
        ),
    )(x_t, w1_t, b1_t, w2_t, b2_t, w3_t, b3_t)

    # (1, padded) -> (batch, 1), drop padding rows.
    return jnp.transpose(out_t[:, :batch])


def init_params(key):
    """Deterministic init mimicking torch.nn.Linear default (U[-1/sqrt(fan_in), +])."""
    def linear(key, fan_in, fan_out):
        kw, kb = jax.random.split(key)
        bound = 1.0 / jnp.sqrt(fan_in)
        # stored as (in, out) so the reference forward is x @ W + b
        w = jax.random.uniform(kw, (fan_in, fan_out), jnp.float32, -bound, bound)
        b = jax.random.uniform(kb, (1, fan_out), jnp.float32, -bound, bound)
        return w, b

    k1, k2, k3 = jax.random.split(key, 3)
    w1, b1 = linear(k1, 9, 16)
    w2, b2 = linear(k2, 16, 8)
    w3, b3 = linear(k3, 8, 1)
    return w1, b1, w2, b2, w3, b3


def reference_forward(x, params):
    """Pure-JAX reference that mirrors the kernel's bf16-input / f32-accumulate math."""
    w1, b1, w2, b2, w3, b3 = params
    bf16, f32 = jnp.bfloat16, jnp.float32
    h = jnp.dot(x.astype(bf16), w1.astype(bf16), preferred_element_type=f32) + b1
    h = jnp.maximum(h, 0.0)
    h = jnp.dot(h.astype(bf16), w2.astype(bf16), preferred_element_type=f32) + b2
    h = jnp.maximum(h, 0.0)
    h = jnp.dot(h.astype(bf16), w3.astype(bf16), preferred_element_type=f32) + b3
    return jax.nn.sigmoid(h)


if __name__ == "__main__":
    key = jax.random.PRNGKey(0)
    kx, kp = jax.random.split(key)
    params = init_params(kp)

    # Small shape consistent with the module (in_features = 9).
    batch = 8
    x = jax.random.normal(kx, (batch, 9), dtype=jnp.float32)
    out = jax.block_until_ready(net_forward(x, params))
    ref = reference_forward(x, params)
    assert out.shape == (batch, 1), out.shape
    assert jnp.allclose(out, ref, atol=2e-3, rtol=2e-3), "mismatch vs reference (batch=8)"

    # Exercise the multi-step batch grid + padding path (grid of 3 tiles of 128).
    batch2 = 300
    x2 = jax.random.normal(jax.random.PRNGKey(1), (batch2, 9), dtype=jnp.float32)
    out2 = jax.block_until_ready(net_forward(x2, params, tile_b=128))
    ref2 = reference_forward(x2, params)
    assert out2.shape == (batch2, 1), out2.shape
    assert jnp.allclose(out2, ref2, atol=2e-3, rtol=2e-3), "mismatch vs reference (batch=300)"

    print("KERNEL_OK")
</pallas_src>

<mosaic_0001>
module attributes {stable_mosaic.version = 11 : i64} {
  func.func @mlp_kernel(%arg0: i32, %arg1: memref<9x128xbf16, #tpu.memory_space<vmem>>, %arg2: memref<16x9xbf16, #tpu.memory_space<vmem>>, %arg3: memref<16x1xf32, #tpu.memory_space<vmem>>, %arg4: memref<8x16xbf16, #tpu.memory_space<vmem>>, %arg5: memref<8x1xf32, #tpu.memory_space<vmem>>, %arg6: memref<1x8xbf16, #tpu.memory_space<vmem>>, %arg7: memref<1x1xf32, #tpu.memory_space<vmem>>, %arg8: memref<1x128xf32, #tpu.memory_space<vmem>>) attributes {dimension_semantics = [#tpu.dimension_semantics<parallel>], iteration_bounds = array<i64: 1>, scalar_prefetch = 0 : i64, scratch_operands = 0 : i64, tpu.core_type = #tpu.core_type<tc>, window_params = [{transform_indices = @transform_0, window_bounds = array<i64: 9, 128>}, {pipeline_mode = #tpu.pipeline_mode<synchronous>, transform_indices = @transform_1, window_bounds = array<i64: 16, 9>}, {pipeline_mode = #tpu.pipeline_mode<synchronous>, transform_indices = @transform_2, window_bounds = array<i64: 16, 1>}, {pipeline_mode = #tpu.pipeline_mode<synchronous>, transform_indices = @transform_3, window_bounds = array<i64: 8, 16>}, {pipeline_mode = #tpu.pipeline_mode<synchronous>, transform_indices = @transform_4, window_bounds = array<i64: 8, 1>}, {pipeline_mode = #tpu.pipeline_mode<synchronous>, transform_indices = @transform_5, window_bounds = array<i64: 1, 8>}, {pipeline_mode = #tpu.pipeline_mode<synchronous>, transform_indices = @transform_6, window_bounds = array<i64: 1, 1>}, {transform_indices = @transform_7, window_bounds = array<i64: 1, 128>}]} {
    %c0 = arith.constant 0 : index
    %c0_0 = arith.constant 0 : index
    %0 = vector.load %arg1[%c0, %c0_0] : memref<9x128xbf16, #tpu.memory_space<vmem>>, vector<9x128xbf16>
    %c0_1 = arith.constant 0 : index
    %c0_2 = arith.constant 0 : index
    %1 = vector.load %arg2[%c0_1, %c0_2] : memref<16x9xbf16, #tpu.memory_space<vmem>>, vector<16x9xbf16>
    %cst = arith.constant dense<0.000000e+00> : vector<16x128xf32>
    %2 = tpu.matmul %1, %0, %cst {dimension_numbers = #tpu.dot_dimension_numbers<[1], [0], [0], [1], [0, 0, 1, 1], [], []>} : vector<16x9xbf16>, vector<9x128xbf16>, vector<16x128xf32> -> vector<16x128xf32>
    %c0_3 = arith.constant 0 : index
    %c0_4 = arith.constant 0 : index
    %3 = vector.load %arg3[%c0_3, %c0_4] : memref<16x1xf32, #tpu.memory_space<vmem>>, vector<16x1xf32>
    %4 = vector.broadcast %3 : vector<16x1xf32> to vector<16x128xf32>
    %5 = arith.addf %2, %4 : vector<16x128xf32>
    %cst_5 = arith.constant 0.000000e+00 : f32
    %6 = vector.broadcast %cst_5 : f32 to vector<16x128xf32>
    %7 = arith.maximumf %5, %6 : vector<16x128xf32>
    %c0_6 = arith.constant 0 : index
    %c0_7 = arith.constant 0 : index
    %8 = vector.load %arg4[%c0_6, %c0_7] : memref<8x16xbf16, #tpu.memory_space<vmem>>, vector<8x16xbf16>
    %9 = arith.truncf %7 : vector<16x128xf32> to vector<16x128xbf16>
    %cst_8 = arith.constant dense<0.000000e+00> : vector<8x128xf32>
    %10 = tpu.matmul %8, %9, %cst_8 {dimension_numbers = #tpu.dot_dimension_numbers<[1], [0], [0], [1], [0, 0, 1, 1], [], []>} : vector<8x16xbf16>, vector<16x128xbf16>, vector<8x128xf32> -> vector<8x128xf32>
    %c0_9 = arith.constant 0 : index
    %c0_10 = arith.constant 0 : index
    %11 = vector.load %arg5[%c0_9, %c0_10] : memref<8x1xf32, #tpu.memory_space<vmem>>, vector<8x1xf32>
    %12 = vector.broadcast %11 : vector<8x1xf32> to vector<8x128xf32>
    %13 = arith.addf %10, %12 : vector<8x128xf32>
    %cst_11 = arith.constant 0.000000e+00 : f32
    %14 = vector.broadcast %cst_11 : f32 to vector<8x128xf32>
    %15 = arith.maximumf %13, %14 : vector<8x128xf32>
    %c0_12 = arith.constant 0 : index
    %c0_13 = arith.constant 0 : index
    %16 = vector.load %arg6[%c0_12, %c0_13] : memref<1x8xbf16, #tpu.memory_space<vmem>>, vector<1x8xbf16>
    %17 = arith.truncf %15 : vector<8x128xf32> to vector<8x128xbf16>
    %cst_14 = arith.constant dense<0.000000e+00> : vector<1x128xf32>
    %18 = tpu.matmul %16, %17, %cst_14 {dimension_numbers = #tpu.dot_dimension_numbers<[1], [0], [0], [1], [0, 0, 1, 1], [], []>} : vector<1x8xbf16>, vector<8x128xbf16>, vector<1x128xf32> -> vector<1x128xf32>
    %c0_15 = arith.constant 0 : index
    %c0_16 = arith.constant 0 : index
    %19 = vector.load %arg7[%c0_15, %c0_16] : memref<1x1xf32, #tpu.memory_space<vmem>>, vector<1x1xf32>
    %20 = vector.broadcast %19 : vector<1x1xf32> to vector<1x128xf32>
    %21 = arith.addf %18, %20 : vector<1x128xf32>
    %cst_17 = arith.constant 0.000000e+00 : f32
    %22 = vector.broadcast %cst_17 : f32 to vector<1x128xf32>
    %23 = arith.subf %22, %21 : vector<1x128xf32>
    %24 = math.exp %23 : vector<1x128xf32>
    %cst_18 = arith.constant 1.000000e+00 : f32
    %25 = vector.broadcast %cst_18 : f32 to vector<1x128xf32>
    %26 = arith.addf %25, %24 : vector<1x128xf32>
    %27 = tpu.reciprocal %26 {approx = true} : vector<1x128xf32> -> vector<1x128xf32>
    %c0_19 = arith.constant 0 : index
    %c0_20 = arith.constant 0 : index
    %28 = vector.load %arg8[%c0_19, %c0_20] : memref<1x128xf32, #tpu.memory_space<vmem>>, vector<1x128xf32>
    tpu.vector_store %arg8[%c0_19, %c0_20], %27 {strides = array<i32>} : memref<1x128xf32, #tpu.memory_space<vmem>>, vector<1x128xf32>,
    return
  }
  func.func @transform_0(%arg0: i32) -> (i32, i32) {
    %c0_i32 = arith.constant 0 : i32
    %c0_i32_0 = arith.constant 0 : i32
    return %c0_i32, %arg0 : i32, i32
  }
  func.func @transform_1(%arg0: i32) -> (i32, i32) {
    %c0_i32 = arith.constant 0 : i32
    %c0_i32_0 = arith.constant 0 : i32
    %c0_i32_1 = arith.constant 0 : i32
    return %c0_i32, %c0_i32_0 : i32, i32
  }
  func.func @transform_2(%arg0: i32) -> (i32, i32) {
    %c0_i32 = arith.constant 0 : i32
    %c0_i32_0 = arith.constant 0 : i32
    %c0_i32_1 = arith.constant 0 : i32
    return %c0_i32, %c0_i32_0 : i32, i32
  }
  func.func @transform_3(%arg0: i32) -> (i32, i32) {
    %c0_i32 = arith.constant 0 : i32
    %c0_i32_0 = arith.constant 0 : i32
    %c0_i32_1 = arith.constant 0 : i32
    return %c0_i32, %c0_i32_0 : i32, i32
  }
  func.func @transform_4(%arg0: i32) -> (i32, i32) {
    %c0_i32 = arith.constant 0 : i32
    %c0_i32_0 = arith.constant 0 : i32
    %c0_i32_1 = arith.constant 0 : i32
    return %c0_i32, %c0_i32_0 : i32, i32
  }
  func.func @transform_5(%arg0: i32) -> (i32, i32) {
    %c0_i32 = arith.constant 0 : i32
    %c0_i32_0 = arith.constant 0 : i32
    %c0_i32_1 = arith.constant 0 : i32
    return %c0_i32, %c0_i32_0 : i32, i32
  }
  func.func @transform_6(%arg0: i32) -> (i32, i32) {
    %c0_i32 = arith.constant 0 : i32
    %c0_i32_0 = arith.constant 0 : i32
    %c0_i32_1 = arith.constant 0 : i32
    return %c0_i32, %c0_i32_0 : i32, i32
  }
  func.func @transform_7(%arg0: i32) -> (i32, i32) {
    %c0_i32 = arith.constant 0 : i32
    %c0_i32_0 = arith.constant 0 : i32
    return %c0_i32, %arg0 : i32, i32
  }
}

</mosaic_0001>

<bundles_post_ra>
// kernel: tpu_custom_call.1
= control target key start
LH: loop header
LB: loop body
LE: loop exit
PB: predicated region body
PF: predicated region fallthrough
CT: control target
= control target key end

     0   :  { %s394_s0 = inlined_call_operand.vmem [shape: bf16[9,128], index: 0, kind: input, shape index: {}]   ;;  %s395_s1 = inlined_call_operand.vmem [shape: bf16[16,9], index: 1, kind: input, shape index: {}]   ;;  %s396_s2 = inlined_call_operand.vmem [shape: f32[16,1], index: 2, kind: input, shape index: {}]   ;;  %s397_s3 = inlined_call_operand.vmem [shape: bf16[8,16], index: 3, kind: input, shape index: {}]   ;;  %s398_s4 = inlined_call_operand.vmem [shape: f32[8,1], index: 4, kind: input, shape index: {}]   ;;  %s399_s5 = inlined_call_operand.vmem [shape: bf16[1,8], index: 5, kind: input, shape index: {}]   ;;  %s400_s6 = inlined_call_operand.<no memory space> [shape: f32[1,1], index: 6, kind: input, shape index: {}]   ;;  %s401_s7 = inlined_call_operand.hbm [shape: f32[1,128], index: 7, kind: output, shape index: {}]  }
   0x1   :  { %v12_v0 = vstv %s400_s6 }
   0x2   :  { %13 = vst [vmem:[#allocation2] sm:$0x1] %v12_v0 }
   0x3   :  { %vm60_vm0 = vcmask 1043456   ;;  %v308_v1 = vmov 0.0   ;;  %v278_v2 = vld [vmem:[%s394_s0] sm:$0x1f]   ;;  %vm61_vm1 = vcmask 1044480   ;;  %v309_v3 = vmov 65535  }
   0x4   :  { %253 = vmatprep.subr.bf16.mxu0 %v308_v1  ;;  %259 = vmatprep.subr.bf16.mxu1 %v308_v1  ;;  %v62_v4 = vsel %vm60_vm0, 4294967295, %v309_v3  ;;  %vm310_vm2 = vmmov 0   ;;  %v34_v6 = vld [vmem:[%s396_s2] sm:$0xff] }
   0x5   :  { %255 = vmatprep.mubr.msk.bf16.mxu0 %vm310_vm2, %v308_v1  ;;  %261 = vmatprep.mubr.msk.bf16.mxu1 %vm310_vm2, %v308_v1  ;;  %v63_v5 = vsel %vm61_vm1, %v62_v4, 0 }
   0x6   :  { %14 = vsyncpa [#allocation4], 0  ;;  %v65_v7 = vand.u32 %v278_v2, %v63_v5  ;;  %v311_v8 = vmov 0   ;;  %v279_v9 = vld [vmem:[%s395_s1] sm:$0xff]   ;;  %vm56_vm3 = vcmask 72704   ;;  %v35_v10 = vld [vmem:[%s396_s2 + $0x8] sm:$0xff]  ;;  %v171_v35 = vlaneseq }
   0x7   :  { %276 = vset.pattern.permute.xlu0 %v311_v8  ;;  %277 = vset.pattern.permute.xlu1 %v311_v8  ;;  %v112_v11 = vld [vmem:[%s398_s4] sm:$0xff]  ;;  %vm118_vm4 = vcmask 130048   ;;  %vm175_vm5 = vcmask 64512  }
   0x8   :  { %38 = vperm.xlu0 %276, %v34_v6   ;;  %254 = vmatpush3.bf16.msra.mxu0 %v65_v7  ;;  %v110_v24 = vld [vmem:[%s397_s3] sm:$0xf]  ;;  %v172_v36 = vshrl.u32 %v171_v35, 7  ;;  %s312_s3 = smov [#allocation3]  }
   0x9   :  { %265 = vmatprep.subr.bf16.mxu0 %v308_v1  ;;  %115 = vperm.xlu1 %277, %v112_v11   ;;  %v165_v12 = vld [vmem:[#allocation2] sm:$0x1] }
   0xa   :  { %v163_v34 = vld [vmem:[%s399_s5] sm:$0x1]  ;;  %v173_v37 = vsub.s32 0, %v172_v36  ;;  %s234_s5 = sshll.u32 %s312_s3, 4  ;;  %s235_s5 = int_to_ptr.vmem [resolvable:$true] %s234_s5 }
   0xb   :  { %256 = vmatmul.mubr.msk.bf16.vlgmr.msra.gmra.mrb[0].mxu0 %vm56_vm3, %v279_v9  ;;  %s284_s12 = scalar_lea.vmem %s235_s5, 16  ;;  %s288_s13 = scalar_lea.vmem %s235_s5, 32 }
   0xc   :  { %43 = vperm.xlu0 %276, %v35_v10   ;;  %267 = vmatprep.mubr.msk.bf16.mxu0 %vm310_vm2, %v308_v1  ;;  %p285_p0 = scmp.ne.s32.totalorder %s235_s5, %s284_s12  ;;  %p289_p1 = scmp.lt.s32.totalorder %s235_s5, %s235_s5 }
   0xd   :  { %168 = vperm.xlu1 %277, %v165_v12   ;;  %p290_p2 = scmp.lt.s32.totalorder %s288_s13, %s284_s12 }
   0xf   :  { %p291_p3 = por %p290_p2, %p289_p1 }
  0x11   :  { %p292_p4 = pnand %p291_p3, %p285_p0 }
  0x87   :  { %v39_v13 = vpop.permute.xlu0 %38 }
  0x88   :  { %v116_v25 = vpop.permute.xlu1 %115 }
  0x8b   :  { %v44_v17 = vpop.permute.xlu0 %43 }
  0x8c   :  { %v169_v38 = vpop.permute.xlu1 %168 }
  0x8d   :  { %v174_v39 = vrot.slane %v169_v38, %v173_v37 }
  0xde   :  { %v101_v14 = vpop.f32.mrb[0].mxu0 }
  0xdf   :  { %v102_v15 = vadd.f32 %v101_v14, %v39_v13  ;;  %v257_v16 = vpop.f32.mrb[1].mxu0 }
  0xe0   :  { %v104_v18 = vpop.f32.mrb[2].mxu0 }
  0xe1   :  { %v105_v19 = vadd.f32 %v104_v18, %v44_v17  ;;  %v258_v20 = vpop.f32.mrb[3].mxu0  ;;  %v108_v21 = vmax.f32 %v102_v15, 0.0 }
  0xe3   :  { %v109_v22 = vmax.f32 %v105_v19, 0.0 }
  0xe5   :  { %v111_v23 = vpack.c.bf16 %v109_v22, %v108_v21 }
  0xe7   :  { %260 = vmatpush3.bf16.msra.mxu1 %v111_v23 }
  0xea   :  { %262 = vmatmul.mubr.msk.bf16.vlgmr.msra.gmra.mrb[0].mxu1 %vm118_vm4, %v110_v24 }
 0x1bd   :  { %v156_v26 = vpop.f32.mrb[0].mxu1 }
 0x1be   :  { %v157_v27 = vadd.f32 %v156_v26, %v116_v25  ;;  %v263_v28 = vpop.f32.mrb[1].mxu1 }
 0x1bf   :  { %v159_v29 = vpop.f32.mrb[2].mxu1 }
 0x1c0   :  { %v162_v30 = vmax.f32 %v157_v27, 0.0  ;;  %v264_v31 = vpop.f32.mrb[3].mxu1 }
 0x1c2   :  { %v164_v32 = vpack.c.bf16 %v162_v30, %v162_v30 }
 0x1c4   :  { %v180_v33 = vsel %vm60_vm0, %v164_v32, 0 }
 0x1c5   :  { %266 = vmatpush3.bf16.msra.mxu0 %v180_v33 }
 0x1c8   :  { %268 = vmatmul.mubr.msk.bf16.vlgmr.msra.gmra.mrb[4].mxu0 %vm175_vm5, %v163_v34 }
 0x29b   :  { %v216_v40 = vpop.f32.mrb[4].mxu0 }
 0x29c   :  { %v217_v41 = vadd.f32 %v216_v40, %v174_v39  ;;  %v269_v42 = vpop.f32.mrb[5].mxu0 }
 0x29d   :  { %v219_v43 = vpop.f32.mrb[6].mxu0 }
 0x29e   :  { %v222_v44 = vsub.f32 0.0, %v217_v41  ;;  %v270_v45 = vpop.f32.mrb[7].mxu0 }
 0x2a0   :  { %v223_v46 = vmul.f32 1.442695, %v222_v44 }
 0x2a2   :  { %280 = vpow2.f32 %v223_v46 }
 0x2ac   :  { %v281_v47 = vpop.eup %280 }
 0x2ad   :  { %v225_v48 = vadd.f32 1.0, %v281_v47 }
 0x2af   :  { %282 = vrcp.f32 %v225_v48 }
 0x2b9   :  { %v283_v49 = vpop.eup %282 }
 0x2ba   :  { %227 = vst [vmem:[#allocation3] sm:$0x1] %v283_v49 }
 0x2bb   :  { %295 = shalt.err (!%p292_p4)
}
 0x2bc   :  { %s296_s16 = scalar_lea.hbm %s401_s7, 16 }
 0x2bd   :  { %p297_p5 = scmp.ne.s32.totalorder %s401_s7, %s296_s16  ;;  %p300_p6 = scmp.lt.u32.totalorder %s296_s16, %s401_s7 }
 0x2bf   :  { %p302_p7 = pnand %p300_p6, %p297_p5 }
 0x2c1   :  { %305 = shalt.err (!%p302_p7)
}
 0x2c2   :  { %237 = dma.vmem_to_hbm [thread:$0]  %s235_s5, 16, %s401_s7, [#allocation4]  }
 0x2c3   :  { %306 = dma.done.wait [#allocation4], 16  }
 0x2c4   :  { %307 = vsyncadd [#allocation4], 4294967280 }
 0x2c5   :  { %241 = vsyncpa [#allocation4], 1 }

</bundles_post_ra>
